<compile_context>
chip_gen: v6e
topology: v6e:2x2x1
jax: 0.10.0
libtpu: 0.0.40
codegen_flags: <defaults>
</compile_context>

<pallas_src>
import functools

import jax
import jax.numpy as jnp
from jax.experimental import pallas as pl
from jax.experimental.pallas import tpu as pltpu


def _round_up(x, m):
    return ((x + m - 1) // m) * m


def _stage1_kernel(logits_ref, labels_ref, nerr_ref, fg_ref, *, n_valid, tile):
    """Softmax over classes + per-class fg / negated errors, with tail masking.

    logits_ref: (C, T) f32   raw logits, classes on sublanes, positions on lanes
    labels_ref: (1, T) i32
    nerr_ref  : (C, T) f32   -|fg - softmax(logits)[c]|   (0 on padded tail)
    fg_ref    : (C, T) bf16  (labels == c)                (0 on padded tail)

    Errors are written negated so lax.sort (ascending) gives descending errors
    directly; fg is exactly 0/1 so bf16 is lossless and halves its HBM traffic.
    """
    i = pl.program_id(0)

    x = logits_ref[...]
    # numerically stable softmax over the class (sublane) axis
    x = x - jnp.max(x, axis=0, keepdims=True)
    ex = jnp.exp(x)
    p = ex / jnp.sum(ex, axis=0, keepdims=True)

    shape = x.shape
    cls = jax.lax.broadcasted_iota(jnp.int32, shape, 0)
    pos = jax.lax.broadcasted_iota(jnp.int32, shape, 1) + i * tile
    valid = (pos < n_valid).astype(jnp.float32)

    fg = (labels_ref[...] == cls).astype(jnp.float32) * valid
    fg_ref[...] = fg.astype(jnp.bfloat16)            # 0/1 -> exact in bf16
    nerr_ref[...] = -(jnp.abs(fg - p) * valid)


def _stage2_kernel(nerr_ref, fg_ref, gts_ref, loss_ref, cs_carry, *, tile):
    """Lovasz-grad dot product over descending-sorted (errors, fg).

    nerr_ref: (C, T) f32   negated errors, sorted ascending (== errors descending)
    fg_ref  : (C, T) bf16  fg co-permuted by the same order
    gts_ref : (C, 1) f32   total per-class foreground count
    loss_ref: (C, 1) f32   accumulator: per-class Lovasz loss
    cs_carry: (C, 1) f32   VMEM scratch: running fg cumsum from previous tiles
    """
    i = pl.program_id(0)

    @pl.when(i == 0)
    def _init():
        loss_ref[...] = jnp.zeros_like(loss_ref)
        cs_carry[...] = jnp.zeros_like(cs_carry)

    fg = fg_ref[...].astype(jnp.float32)
    nerr = nerr_ref[...]
    gts = gts_ref[...]

    # Inclusive cumsum of fg along the sorted (lane) axis via a Hillis-Steele
    # log-step scan: pltpu.roll (XLU) + masked add (VPU). Replaces the old
    # (tile, tile) upper-triangular MXU matmul (which was <4% MXU-utilized and
    # double-buffered a 4 MiB constant in VMEM).
    lane = jax.lax.broadcasted_iota(jnp.int32, fg.shape, 1)
    cs = fg
    shift = 1
    while shift < tile:
        rolled = pltpu.roll(cs, shift, axis=1)
        cs = cs + jnp.where(lane >= shift, rolled, 0.0)
        shift *= 2
    cs = cs + cs_carry[...]            # fold in the cumsum from earlier tiles

    pos = lane + i * tile              # 0-based global sorted position
    pos1 = (pos + 1).astype(jnp.float32)   # exact up to P ~ 2^24 pixels

    # jaccard[k]   = 1 - (gts - cs[k]) / (gts + (k+1) - cs[k])
    # jaccard[k-1] recomputed in closed form from cs[k] - fg[k]  (no lane shift)
    jac = 1.0 - (gts - cs) / (gts + pos1 - cs)
    cs_prev = cs - fg
    first = pos == 0
    denom_prev = jnp.where(first, 1.0, gts + (pos1 - 1.0) - cs_prev)
    jac_prev = jnp.where(first, 0.0, 1.0 - (gts - cs_prev) / denom_prev)

    # err = -nerr;  loss_c += sum(err * (jac - jac_prev)); padded tail has nerr==0
    loss_ref[...] += jnp.sum(nerr * (jac_prev - jac), axis=1, keepdims=True)

    cs_carry[...] = cs[:, tile - 1:tile]


@jax.jit
def lovasz_loss(probas, labels):
    """Pallas implementation of LOVASZ.forward(probas, labels).

    probas: [B, C, H, W] raw logits (softmax over dim=1 applied inside).
    labels: [B, H, W]    integer class labels in [0, C).
    """
    B, C, H, W = probas.shape
    P = B * H * W

    # [C, P] lane-dense layout; P enumerates (b, h, w) row-major, matching
    # labels.view(-1) / probas.permute(0,2,3,1).view(-1, C) in the spec.
    logits = jnp.transpose(probas, (1, 0, 2, 3)).reshape(C, P).astype(jnp.float32)
    lbl = labels.reshape(1, P).astype(jnp.int32)

    # Per-class foreground counts straight from labels: a tiny fused XLA
    # compare+reduce (reads P int32 once). Removing the in-kernel accumulator
    # lets the stage-1 grid axis be fully 'parallel'.
    gts = jnp.sum(
        (lbl == jnp.arange(C, dtype=jnp.int32)[:, None]).astype(jnp.float32),
        axis=1, keepdims=True)                                        # (C, 1)

    # Static tile sizes: stage 1 is a pure elementwise map -> very wide lane
    # tiles (VMEM use is only a few MiB even at 32768 lanes); stage 2 runs a
    # log-step scan per tile so it stays at a few thousand lanes.
    t2 = min(4096, _round_up(P, 128))
    t1 = min(32768, _round_up(P, t2))
    p_pad = _round_up(P, t1)
    if p_pad != P:  # only pay the pad pass when the tail is ragged
        logits = jnp.pad(logits, ((0, 0), (0, p_pad - P)))
        lbl = jnp.pad(lbl, ((0, 0), (0, p_pad - P)))

    nerr, fg = pl.pallas_call(
        functools.partial(_stage1_kernel, n_valid=P, tile=t1),
        out_shape=(jax.ShapeDtypeStruct((C, p_pad), jnp.float32),
                   jax.ShapeDtypeStruct((C, p_pad), jnp.bfloat16)),
        grid=(p_pad // t1,),
        in_specs=[pl.BlockSpec((C, t1), lambda i: (0, i)),
                  pl.BlockSpec((1, t1), lambda i: (0, i))],
        out_specs=(pl.BlockSpec((C, t1), lambda i: (0, i)),
                   pl.BlockSpec((C, t1), lambda i: (0, i))),
        compiler_params=pltpu.CompilerParams(
            dimension_semantics=("parallel",)),
    )(logits, lbl)

    # TODO(synk): the per-class descending sort (torch.sort) has no clean Pallas
    # TPU equivalent; it is done with XLA's lax.sort between the two kernels.
    # The key is already negated (ascending == descending on errors) and fg is a
    # bf16 payload, so no extra elementwise HBM passes bracket the sort.
    nerr_sorted, fg_sorted = jax.lax.sort((nerr, fg), dimension=1, num_keys=1)

    loss_c = pl.pallas_call(
        functools.partial(_stage2_kernel, tile=t2),
        out_shape=jax.ShapeDtypeStruct((C, 1), jnp.float32),
        grid=(p_pad // t2,),
        in_specs=[pl.BlockSpec((C, t2), lambda i: (0, i)),
                  pl.BlockSpec((C, t2), lambda i: (0, i)),
                  pl.BlockSpec((C, 1), lambda i: (0, 0))],
        out_specs=pl.BlockSpec((C, 1), lambda i: (0, 0)),
        scratch_shapes=[pltpu.VMEM((C, 1), jnp.float32)],
        compiler_params=pltpu.CompilerParams(
            dimension_semantics=("arbitrary",)),
    )(nerr_sorted, fg_sorted, gts)

    # classes='present': average only over classes that appear in labels.
    present = (gts[:, 0] > 0).astype(jnp.float32)
    n_present = jnp.sum(present)
    total = jnp.sum(loss_c[:, 0] * present)
    return jnp.where(n_present > 0, total / jnp.maximum(n_present, 1.0), 0.0)


def _reference(probas, labels):
    """Pure-JAX mirror of lovasz_softmax(F.softmax(probas, 1), labels)."""
    B, C, H, W = probas.shape
    p = jax.nn.softmax(probas.astype(jnp.float32), axis=1)
    p = jnp.transpose(p, (0, 2, 3, 1)).reshape(-1, C)
    lbl = labels.reshape(-1)
    losses, present = [], []
    for c in range(C):
        fg = (lbl == c).astype(jnp.float32)
        errors = jnp.abs(fg - p[:, c])
        order = jnp.argsort(-errors)
        errors_sorted = errors[order]
        fg_sorted = fg[order]
        gts = jnp.sum(fg_sorted)
        inter = gts - jnp.cumsum(fg_sorted)
        union = gts + jnp.cumsum(1.0 - fg_sorted)
        jac = 1.0 - inter / union
        jac = jnp.concatenate([jac[:1], jac[1:] - jac[:-1]])
        losses.append(jnp.dot(errors_sorted, jac))
        present.append(gts > 0)
    losses = jnp.stack(losses)
    present = jnp.stack(present).astype(jnp.float32)
    n = jnp.sum(present)
    return jnp.where(n > 0, jnp.sum(losses * present) / jnp.maximum(n, 1.0), 0.0)


if __name__ == "__main__":
    key = jax.random.PRNGKey(0)
    k1, k2, k3, k4 = jax.random.split(key, 4)

    # Shapes implied by the module: probas [B, C, H, W] logits, labels [B, H, W] ints.
    B, C, H, W = 2, 4, 16, 16
    logits = jax.random.normal(k1, (B, C, H, W), jnp.float32)
    labels = jax.random.randint(k2, (B, H, W), 0, C, jnp.int32)

    loss = jax.block_until_ready(lovasz_loss(logits, labels))
    ref = _reference(logits, labels)
    assert jnp.allclose(loss, ref, rtol=1e-4, atol=1e-5), (loss, ref)

    # Non-128-aligned flattened size exercises the in-kernel tail masking path.
    B2, C2, H2, W2 = 2, 3, 10, 10
    logits2 = jax.random.normal(k3, (B2, C2, H2, W2), jnp.float32)
    labels2 = jax.random.randint(k4, (B2, H2, W2), 0, C2, jnp.int32)
    loss2 = jax.block_until_ready(lovasz_loss(logits2, labels2))
    ref2 = _reference(logits2, labels2)
    assert jnp.allclose(loss2, ref2, rtol=1e-4, atol=1e-5), (loss2, ref2)

    print("KERNEL_OK")
</pallas_src>

<mosaic_0001>
module attributes {stable_mosaic.version = 11 : i64} {
  func.func @_stage1_kernel(%arg0: i32, %arg1: memref<4x512xf32, #tpu.memory_space<vmem>>, %arg2: memref<1x512xi32, #tpu.memory_space<vmem>>, %arg3: memref<4x512xf32, #tpu.memory_space<vmem>>, %arg4: memref<4x512xbf16, #tpu.memory_space<vmem>>) attributes {dimension_semantics = [#tpu.dimension_semantics<parallel>], iteration_bounds = array<i64: 1>, scalar_prefetch = 0 : i64, scratch_operands = 0 : i64, tpu.core_type = #tpu.core_type<tc>, window_params = [{transform_indices = @transform_0, window_bounds = array<i64: 4, 512>}, {transform_indices = @transform_1, window_bounds = array<i64: 1, 512>}, {transform_indices = @transform_2, window_bounds = array<i64: 4, 512>}, {transform_indices = @transform_3, window_bounds = array<i64: 4, 512>}]} {
    %c0 = arith.constant 0 : index
    %c0_0 = arith.constant 0 : index
    %0 = vector.load %arg1[%c0, %c0_0] : memref<4x512xf32, #tpu.memory_space<vmem>>, vector<4x512xf32>
    %cst = arith.constant dense<0xFF800000> : vector<512xf32>
    %1 = vector.multi_reduction <maximumf>, %0, %cst [0] : vector<4x512xf32> to vector<512xf32>
    %2 = vector.shape_cast %1 : vector<512xf32> to vector<1x512xf32>
    %3 = vector.broadcast %2 : vector<1x512xf32> to vector<4x512xf32>
    %4 = arith.subf %0, %3 : vector<4x512xf32>
    %5 = math.exp %4 : vector<4x512xf32>
    %cst_1 = arith.constant dense<0.000000e+00> : vector<512xf32>
    %6 = vector.multi_reduction <add>, %5, %cst_1 [0] : vector<4x512xf32> to vector<512xf32>
    %7 = vector.shape_cast %6 : vector<512xf32> to vector<1x512xf32>
    %8 = vector.broadcast %7 : vector<1x512xf32> to vector<4x512xf32>
    %9 = arith.divf %5, %8 : vector<4x512xf32>
    %10 = tpu.iota {dimensions = array<i32: 0>} : vector<4x512xi32>
    %11 = tpu.iota {dimensions = array<i32: 1>} : vector<4x512xi32>
    %c512_i32 = arith.constant 512 : i32
    %12 = arith.muli %arg0, %c512_i32 : i32
    %13 = vector.broadcast %12 : i32 to vector<4x512xi32>
    %14 = arith.addi %11, %13 : vector<4x512xi32>
    %c512_i32_2 = arith.constant 512 : i32
    %15 = vector.broadcast %c512_i32_2 : i32 to vector<4x512xi32>
    %16 = arith.cmpi slt, %14, %15 : vector<4x512xi32>
    %17 = arith.extui %16 : vector<4x512xi1> to vector<4x512xi32>
    %18 = arith.sitofp %17 : vector<4x512xi32> to vector<4x512xf32>
    %c0_3 = arith.constant 0 : index
    %c0_4 = arith.constant 0 : index
    %19 = vector.load %arg2[%c0_3, %c0_4] : memref<1x512xi32, #tpu.memory_space<vmem>>, vector<1x512xi32>
    %20 = vector.broadcast %19 : vector<1x512xi32> to vector<4x512xi32>
    %21 = arith.cmpi eq, %20, %10 : vector<4x512xi32>
    %22 = arith.extui %21 : vector<4x512xi1> to vector<4x512xi32>
    %23 = arith.sitofp %22 : vector<4x512xi32> to vector<4x512xf32>
    %24 = arith.mulf %23, %18 : vector<4x512xf32>
    %25 = arith.truncf %24 : vector<4x512xf32> to vector<4x512xbf16>
    %c0_5 = arith.constant 0 : index
    %c0_6 = arith.constant 0 : index
    %26 = vector.load %arg4[%c0_5, %c0_6] : memref<4x512xbf16, #tpu.memory_space<vmem>>, vector<4x512xbf16>
    tpu.vector_store %arg4[%c0_5, %c0_6], %25 {strides = array<i32>} : memref<4x512xbf16, #tpu.memory_space<vmem>>, vector<4x512xbf16>,
    %27 = arith.subf %24, %9 : vector<4x512xf32>
    %28 = math.absf %27 : vector<4x512xf32>
    %29 = arith.mulf %28, %18 : vector<4x512xf32>
    %cst_7 = arith.constant 0.000000e+00 : f32
    %30 = vector.broadcast %cst_7 : f32 to vector<4x512xf32>
    %31 = arith.subf %30, %29 : vector<4x512xf32>
    %c0_8 = arith.constant 0 : index
    %c0_9 = arith.constant 0 : index
    %32 = vector.load %arg3[%c0_8, %c0_9] : memref<4x512xf32, #tpu.memory_space<vmem>>, vector<4x512xf32>
    tpu.vector_store %arg3[%c0_8, %c0_9], %31 {strides = array<i32>} : memref<4x512xf32, #tpu.memory_space<vmem>>, vector<4x512xf32>,
    return
  }
  func.func @transform_0(%arg0: i32) -> (i32, i32) {
    %c0_i32 = arith.constant 0 : i32
    %c0_i32_0 = arith.constant 0 : i32
    return %c0_i32, %arg0 : i32, i32
  }
  func.func @transform_1(%arg0: i32) -> (i32, i32) {
    %c0_i32 = arith.constant 0 : i32
    %c0_i32_0 = arith.constant 0 : i32
    return %c0_i32, %arg0 : i32, i32
  }
  func.func @transform_2(%arg0: i32) -> (i32, i32) {
    %c0_i32 = arith.constant 0 : i32
    %c0_i32_0 = arith.constant 0 : i32
    return %c0_i32, %arg0 : i32, i32
  }
  func.func @transform_3(%arg0: i32) -> (i32, i32) {
    %c0_i32 = arith.constant 0 : i32
    %c0_i32_0 = arith.constant 0 : i32
    return %c0_i32, %arg0 : i32, i32
  }
}

module attributes {stable_mosaic.version = 11 : i64} {
  func.func @_stage2_kernel(%arg0: i32, %arg1: memref<4x512xf32, #tpu.memory_space<vmem>>, %arg2: memref<4x512xbf16, #tpu.memory_space<vmem>>, %arg3: memref<4x1xf32, #tpu.memory_space<vmem>>, %arg4: memref<4x1xf32, #tpu.memory_space<vmem>>, %arg5: memref<4x1xf32, #tpu.memory_space<vmem>>) attributes {dimension_semantics = [#tpu.dimension_semantics<arbitrary>], iteration_bounds = array<i64: 1>, scalar_prefetch = 0 : i64, scratch_operands = 1 : i64, tpu.core_type = #tpu.core_type<tc>, window_params = [{transform_indices = @transform_0, window_bounds = array<i64: 4, 512>}, {transform_indices = @transform_1, window_bounds = array<i64: 4, 512>}, {pipeline_mode = #tpu.pipeline_mode<synchronous>, transform_indices = @transform_2, window_bounds = array<i64: 4, 1>}, {pipeline_mode = #tpu.pipeline_mode<synchronous>, transform_indices = @transform_3, window_bounds = array<i64: 4, 1>}]} {
    %c0_i32 = arith.constant 0 : i32
    %0 = arith.cmpi eq, %arg0, %c0_i32 : i32
    %1 = arith.extui %0 : i1 to i32
    %c0_i32_0 = arith.constant 0 : i32
    %2 = arith.cmpi ne, %1, %c0_i32_0 : i32
    scf.if %2 {
      %cst_39 = arith.constant 0.000000e+00 : f32
      %105 = vector.broadcast %cst_39 : f32 to vector<4x1xf32>
      %c0_40 = arith.constant 0 : index
      %c0_41 = arith.constant 0 : index
      %106 = vector.load %arg4[%c0_40, %c0_41] : memref<4x1xf32, #tpu.memory_space<vmem>>, vector<4x1xf32>
      tpu.vector_store %arg4[%c0_40, %c0_41], %105 {strides = array<i32>} : memref<4x1xf32, #tpu.memory_space<vmem>>, vector<4x1xf32>,
      %cst_42 = arith.constant 0.000000e+00 : f32
      %107 = vector.broadcast %cst_42 : f32 to vector<4x1xf32>
      %c0_43 = arith.constant 0 : index
      %c0_44 = arith.constant 0 : index
      %108 = vector.load %arg5[%c0_43, %c0_44] : memref<4x1xf32, #tpu.memory_space<vmem>>, vector<4x1xf32>
      tpu.vector_store %arg5[%c0_43, %c0_44], %107 {strides = array<i32>} : memref<4x1xf32, #tpu.memory_space<vmem>>, vector<4x1xf32>,
    } else {
    }
    %c0 = arith.constant 0 : index
    %c0_1 = arith.constant 0 : index
    %3 = vector.load %arg2[%c0, %c0_1] : memref<4x512xbf16, #tpu.memory_space<vmem>>, vector<4x512xbf16>
    %4 = arith.extf %3 : vector<4x512xbf16> to vector<4x512xf32>
    %c0_2 = arith.constant 0 : index
    %c0_3 = arith.constant 0 : index
    %5 = vector.load %arg1[%c0_2, %c0_3] : memref<4x512xf32, #tpu.memory_space<vmem>>, vector<4x512xf32>
    %c0_4 = arith.constant 0 : index
    %c0_5 = arith.constant 0 : index
    %6 = vector.load %arg3[%c0_4, %c0_5] : memref<4x1xf32, #tpu.memory_space<vmem>>, vector<4x1xf32>
    %7 = tpu.iota {dimensions = array<i32: 1>} : vector<4x512xi32>
    %c1_i32 = arith.constant 1 : i32
    %8 = tpu.dynamic_rotate %4 by %c1_i32 dim 1 : vector<4x512xf32>, i32 -> vector<4x512xf32>
    %c1_i32_6 = arith.constant 1 : i32
    %9 = vector.broadcast %c1_i32_6 : i32 to vector<4x512xi32>
    %10 = arith.cmpi sge, %7, %9 : vector<4x512xi32>
    %cst = arith.constant 0.000000e+00 : f32
    %11 = vector.broadcast %cst : f32 to vector<4x512xf32>
    %12 = arith.select %10, %8, %11 : vector<4x512xi1>, vector<4x512xf32>
    %13 = arith.addf %4, %12 : vector<4x512xf32>
    %c2_i32 = arith.constant 2 : i32
    %14 = tpu.dynamic_rotate %13 by %c2_i32 dim 1 : vector<4x512xf32>, i32 -> vector<4x512xf32>
    %c2_i32_7 = arith.constant 2 : i32
    %15 = vector.broadcast %c2_i32_7 : i32 to vector<4x512xi32>
    %16 = arith.cmpi sge, %7, %15 : vector<4x512xi32>
    %cst_8 = arith.constant 0.000000e+00 : f32
    %17 = vector.broadcast %cst_8 : f32 to vector<4x512xf32>
    %18 = arith.select %16, %14, %17 : vector<4x512xi1>, vector<4x512xf32>
    %19 = arith.addf %13, %18 : vector<4x512xf32>
    %c4_i32 = arith.constant 4 : i32
    %20 = tpu.dynamic_rotate %19 by %c4_i32 dim 1 : vector<4x512xf32>, i32 -> vector<4x512xf32>
    %c4_i32_9 = arith.constant 4 : i32
    %21 = vector.broadcast %c4_i32_9 : i32 to vector<4x512xi32>
    %22 = arith.cmpi sge, %7, %21 : vector<4x512xi32>
    %cst_10 = arith.constant 0.000000e+00 : f32
    %23 = vector.broadcast %cst_10 : f32 to vector<4x512xf32>
    %24 = arith.select %22, %20, %23 : vector<4x512xi1>, vector<4x512xf32>
    %25 = arith.addf %19, %24 : vector<4x512xf32>
    %c8_i32 = arith.constant 8 : i32
    %26 = tpu.dynamic_rotate %25 by %c8_i32 dim 1 : vector<4x512xf32>, i32 -> vector<4x512xf32>
    %c8_i32_11 = arith.constant 8 : i32
    %27 = vector.broadcast %c8_i32_11 : i32 to vector<4x512xi32>
    %28 = arith.cmpi sge, %7, %27 : vector<4x512xi32>
    %cst_12 = arith.constant 0.000000e+00 : f32
    %29 = vector.broadcast %cst_12 : f32 to vector<4x512xf32>
    %30 = arith.select %28, %26, %29 : vector<4x512xi1>, vector<4x512xf32>
    %31 = arith.addf %25, %30 : vector<4x512xf32>
    %c16_i32 = arith.constant 16 : i32
    %32 = tpu.dynamic_rotate %31 by %c16_i32 dim 1 : vector<4x512xf32>, i32 -> vector<4x512xf32>
    %c16_i32_13 = arith.constant 16 : i32
    %33 = vector.broadcast %c16_i32_13 : i32 to vector<4x512xi32>
    %34 = arith.cmpi sge, %7, %33 : vector<4x512xi32>
    %cst_14 = arith.constant 0.000000e+00 : f32
    %35 = vector.broadcast %cst_14 : f32 to vector<4x512xf32>
    %36 = arith.select %34, %32, %35 : vector<4x512xi1>, vector<4x512xf32>
    %37 = arith.addf %31, %36 : vector<4x512xf32>
    %c32_i32 = arith.constant 32 : i32
    %38 = tpu.dynamic_rotate %37 by %c32_i32 dim 1 : vector<4x512xf32>, i32 -> vector<4x512xf32>
    %c32_i32_15 = arith.constant 32 : i32
    %39 = vector.broadcast %c32_i32_15 : i32 to vector<4x512xi32>
    %40 = arith.cmpi sge, %7, %39 : vector<4x512xi32>
    %cst_16 = arith.constant 0.000000e+00 : f32
    %41 = vector.broadcast %cst_16 : f32 to vector<4x512xf32>
    %42 = arith.select %40, %38, %41 : vector<4x512xi1>, vector<4x512xf32>
    %43 = arith.addf %37, %42 : vector<4x512xf32>
    %c64_i32 = arith.constant 64 : i32
    %44 = tpu.dynamic_rotate %43 by %c64_i32 dim 1 : vector<4x512xf32>, i32 -> vector<4x512xf32>
    %c64_i32_17 = arith.constant 64 : i32
    %45 = vector.broadcast %c64_i32_17 : i32 to vector<4x512xi32>
    %46 = arith.cmpi sge, %7, %45 : vector<4x512xi32>
    %cst_18 = arith.constant 0.000000e+00 : f32
    %47 = vector.broadcast %cst_18 : f32 to vector<4x512xf32>
    %48 = arith.select %46, %44, %47 : vector<4x512xi1>, vector<4x512xf32>
    %49 = arith.addf %43, %48 : vector<4x512xf32>
    %c128_i32 = arith.constant 128 : i32
    %50 = tpu.dynamic_rotate %49 by %c128_i32 dim 1 : vector<4x512xf32>, i32 -> vector<4x512xf32>
    %c128_i32_19 = arith.constant 128 : i32
    %51 = vector.broadcast %c128_i32_19 : i32 to vector<4x512xi32>
    %52 = arith.cmpi sge, %7, %51 : vector<4x512xi32>
    %cst_20 = arith.constant 0.000000e+00 : f32
    %53 = vector.broadcast %cst_20 : f32 to vector<4x512xf32>
    %54 = arith.select %52, %50, %53 : vector<4x512xi1>, vector<4x512xf32>
    %55 = arith.addf %49, %54 : vector<4x512xf32>
    %c256_i32 = arith.constant 256 : i32
    %56 = tpu.dynamic_rotate %55 by %c256_i32 dim 1 : vector<4x512xf32>, i32 -> vector<4x512xf32>
    %c256_i32_21 = arith.constant 256 : i32
    %57 = vector.broadcast %c256_i32_21 : i32 to vector<4x512xi32>
    %58 = arith.cmpi sge, %7, %57 : vector<4x512xi32>
    %cst_22 = arith.constant 0.000000e+00 : f32
    %59 = vector.broadcast %cst_22 : f32 to vector<4x512xf32>
    %60 = arith.select %58, %56, %59 : vector<4x512xi1>, vector<4x512xf32>
    %61 = arith.addf %55, %60 : vector<4x512xf32>
    %c0_23 = arith.constant 0 : index
    %c0_24 = arith.constant 0 : index
    %62 = vector.load %arg5[%c0_23, %c0_24] : memref<4x1xf32, #tpu.memory_space<vmem>>, vector<4x1xf32>
    %63 = vector.broadcast %62 : vector<4x1xf32> to vector<4x512xf32>
    %64 = arith.addf %61, %63 : vector<4x512xf32>
    %c512_i32 = arith.constant 512 : i32
    %65 = arith.muli %arg0, %c512_i32 : i32
    %66 = vector.broadcast %65 : i32 to vector<4x512xi32>
    %67 = arith.addi %7, %66 : vector<4x512xi32>
    %c1_i32_25 = arith.constant 1 : i32
    %68 = vector.broadcast %c1_i32_25 : i32 to vector<4x512xi32>
    %69 = arith.addi %67, %68 : vector<4x512xi32>
    %70 = arith.sitofp %69 : vector<4x512xi32> to vector<4x512xf32>
    %71 = vector.broadcast %6 : vector<4x1xf32> to vector<4x512xf32>
    %72 = arith.subf %71, %64 : vector<4x512xf32>
    %73 = vector.broadcast %6 : vector<4x1xf32> to vector<4x512xf32>
    %74 = arith.addf %73, %70 : vector<4x512xf32>
    %75 = arith.subf %74, %64 : vector<4x512xf32>
    %76 = arith.divf %72, %75 : vector<4x512xf32>
    %cst_26 = arith.constant 1.000000e+00 : f32
    %77 = vector.broadcast %cst_26 : f32 to vector<4x512xf32>
    %78 = arith.subf %77, %76 : vector<4x512xf32>
    %79 = arith.subf %64, %4 : vector<4x512xf32>
    %c0_i32_27 = arith.constant 0 : i32
    %80 = vector.broadcast %c0_i32_27 : i32 to vector<4x512xi32>
    %81 = arith.cmpi eq, %67, %80 : vector<4x512xi32>
    %cst_28 = arith.constant 1.000000e+00 : f32
    %82 = vector.broadcast %cst_28 : f32 to vector<4x512xf32>
    %83 = arith.subf %70, %82 : vector<4x512xf32>
    %84 = vector.broadcast %6 : vector<4x1xf32> to vector<4x512xf32>
    %85 = arith.addf %84, %83 : vector<4x512xf32>
    %86 = arith.subf %85, %79 : vector<4x512xf32>
    %cst_29 = arith.constant 1.000000e+00 : f32
    %87 = vector.broadcast %cst_29 : f32 to vector<4x512xf32>
    %88 = arith.select %81, %87, %86 : vector<4x512xi1>, vector<4x512xf32>
    %89 = vector.broadcast %6 : vector<4x1xf32> to vector<4x512xf32>
    %90 = arith.subf %89, %79 : vector<4x512xf32>
    %91 = arith.divf %90, %88 : vector<4x512xf32>
    %cst_30 = arith.constant 1.000000e+00 : f32
    %92 = vector.broadcast %cst_30 : f32 to vector<4x512xf32>
    %93 = arith.subf %92, %91 : vector<4x512xf32>
    %cst_31 = arith.constant 0.000000e+00 : f32
    %94 = vector.broadcast %cst_31 : f32 to vector<4x512xf32>
    %95 = arith.select %81, %94, %93 : vector<4x512xi1>, vector<4x512xf32>
    %c0_32 = arith.constant 0 : index
    %c0_33 = arith.constant 0 : index
    %96 = vector.load %arg4[%c0_32, %c0_33] : memref<4x1xf32, #tpu.memory_space<vmem>>, vector<4x1xf32>
    %97 = arith.subf %95, %78 : vector<4x512xf32>
    %98 = arith.mulf %5, %97 : vector<4x512xf32>
    %cst_34 = arith.constant dense<0.000000e+00> : vector<4xf32>
    %99 = vector.multi_reduction <add>, %98, %cst_34 [1] : vector<4x512xf32> to vector<4xf32>
    %100 = vector.shape_cast %99 : vector<4xf32> to vector<4x1xf32>
    %101 = arith.addf %96, %100 : vector<4x1xf32>
    %c0_35 = arith.constant 0 : index
    %c0_36 = arith.constant 0 : index
    %102 = vector.load %arg4[%c0_35, %c0_36] : memref<4x1xf32, #tpu.memory_space<vmem>>, vector<4x1xf32>
    tpu.vector_store %arg4[%c0_35, %c0_36], %101 {strides = array<i32>} : memref<4x1xf32, #tpu.memory_space<vmem>>, vector<4x1xf32>,
    %103 = vector.extract_strided_slice %64 {offsets = [0, 511], sizes = [4, 1], strides = [1, 1]} : vector<4x512xf32> to vector<4x1xf32>
    %c0_37 = arith.constant 0 : index
    %c0_38 = arith.constant 0 : index
    %104 = vector.load %arg5[%c0_37, %c0_38] : memref<4x1xf32, #tpu.memory_space<vmem>>, vector<4x1xf32>
    tpu.vector_store %arg5[%c0_37, %c0_38], %103 {strides = array<i32>} : memref<4x1xf32, #tpu.memory_space<vmem>>, vector<4x1xf32>,
    return
  }
  func.func @transform_0(%arg0: i32) -> (i32, i32) {
    %c0_i32 = arith.constant 0 : i32
    %c0_i32_0 = arith.constant 0 : i32
    return %c0_i32, %arg0 : i32, i32
  }
  func.func @transform_1(%arg0: i32) -> (i32, i32) {
    %c0_i32 = arith.constant 0 : i32
    %c0_i32_0 = arith.constant 0 : i32
    return %c0_i32, %arg0 : i32, i32
  }
  func.func @transform_2(%arg0: i32) -> (i32, i32) {
    %c0_i32 = arith.constant 0 : i32
    %c0_i32_0 = arith.constant 0 : i32
    %c0_i32_1 = arith.constant 0 : i32
    return %c0_i32, %c0_i32_0 : i32, i32
  }
  func.func @transform_3(%arg0: i32) -> (i32, i32) {
    %c0_i32 = arith.constant 0 : i32
    %c0_i32_0 = arith.constant 0 : i32
    %c0_i32_1 = arith.constant 0 : i32
    return %c0_i32, %c0_i32_0 : i32, i32
  }
}

</mosaic_0001>

<bundles_post_ra>
// kernel: eq.12
= control target key start
LH: loop header
LB: loop body
LE: loop exit
PB: predicated region body
PF: predicated region fallthrough
CT: control target
= control target key end

     0   :  { %s69_s8 = smov 112   ;;  %s70_s11 = smov 80   ;;  %vm3_vm0 = vcmask 130048   ;;  %vm9_vm1 = vcmask 1048448   ;;  %vm15_vm2 = vcmask 917248   ;;  %vm21_vm3 = vcmask 786048   ;;  %s113_s0 = inlined_call_operand.vmem [shape: s32[2,16,16], index: 0, kind: input, shape index: {}]   ;;  %s114_s1 = inlined_call_operand.vmem [shape: s32[512], index: 1, kind: output, shape index: {}]  }
   0x1   :  { %v55_v0 = vld [vmem:[%s113_s0 + $0x7] ss:$8 sm:$0xf]   ;;  %v57_v1 = vld [vmem:[%s113_s0 + $0x5] ss:$8 sm:$0xf]  }
   0x2   :  { %7 = vrot.lane.b32.xlu0 %v55_v0, %s69_s8  ;;  %19 = vrot.lane.b32.xlu1 %v57_v1, %s70_s11  ;;  %v56_v2 = vld [vmem:[%s113_s0 + $0x6] ss:$8 sm:$0xf]   ;;  %v58_v3 = vld [vmem:[%s113_s0 + $0x4] ss:$8 sm:$0xf]  }
   0x3   :  { %s71_s16 = smov 96   ;;  %v2_v4 = vld [vmem:[%s113_s0] ss:$8 sm:$0xf]   ;;  %s72_s19 = smov 64   ;;  %vm27_vm4 = vcmask 654848  }
   0x4   :  { %v59_v5 = vld [vmem:[%s113_s0 + $0x3] ss:$8 sm:$0xf]   ;;  %4 = vst.msk [vmem:[#allocation0] sm:$0xf] %vm3_vm0, %v2_v4   ;;  %s73_s24 = smov 48  }
   0x5   :  { %v60_v6 = vld [vmem:[%s113_s0 + $0x2] ss:$8 sm:$0xf]   ;;  %s74_s25 = smov 32   ;;  %vm33_vm5 = vcmask 523648   ;;  %vm39_vm6 = vcmask 392448  }
   0x6   :  { %13 = vrot.lane.b32.xlu0 %v56_v2, %s71_s16  ;;  %25 = vrot.lane.b32.xlu1 %v58_v3, %s72_s19  ;;  %v61_v7 = vld [vmem:[%s113_s0 + $0x1] ss:$8 sm:$0xf]   ;;  %s75_s0 = smov 16   ;;  %vm45_vm7 = vcmask 261248  }
   0xa   :  { %31 = vrot.lane.b32.xlu0 %v59_v5, %s73_s24  ;;  %37 = vrot.lane.b32.xlu1 %v60_v6, %s74_s25 }
   0xe   :  { %43 = vrot.lane.b32.xlu0 %v61_v7, %s75_s0 }
  0x74   :  { %v8_v8 = vpop.permute.xlu0 %7   ;;  %v20_v9 = vpop.permute.xlu1 %19  }
  0x75   :  { %10 = vst.msk [vmem:[#allocation0] sm:$0xf] %vm9_vm1, %v8_v8  }
  0x78   :  { %v14_v10 = vpop.permute.xlu0 %13   ;;  %v26_v11 = vpop.permute.xlu1 %25  }
  0x79   :  { %16 = vst.msk [vmem:[#allocation0] sm:$0xf] %vm15_vm2, %v14_v10  }
  0x7a   :  { %22 = vst.msk [vmem:[#allocation0] sm:$0xf] %vm21_vm3, %v20_v9  }
  0x7b   :  { %28 = vst.msk [vmem:[#allocation0] sm:$0xf] %vm27_vm4, %v26_v11  }
  0x7c   :  { %v32_v12 = vpop.permute.xlu0 %31   ;;  %v38_v13 = vpop.permute.xlu1 %37  }
  0x7d   :  { %34 = vst.msk [vmem:[#allocation0] sm:$0xf] %vm33_vm5, %v32_v12  }
  0x7e   :  { %40 = vst.msk [vmem:[#allocation0] sm:$0xf] %vm39_vm6, %v38_v13  }
  0x80   :  { %v44_v14 = vpop.permute.xlu0 %43  }
  0x81   :  { %46 = vst.msk [vmem:[#allocation0] sm:$0xf] %vm45_vm7, %v44_v14  }
  0x88   :  { %v51_v15 = vld [vmem:[#allocation0] sm:$0xf] }
  0x89   :  { %54 = vst [vmem:[%s114_s1] sm:$0xf] %v51_v15 }

// kernel: lovasz_loss.2
= control target key start
LH: loop header
LB: loop body
LE: loop exit
PB: predicated region body
PF: predicated region fallthrough
CT: control target
= control target key end

     0   :  { %v110_v0 = vlaneseq  ;;  %vm21_vm0 = vcmask 1043456   ;;  %v253_v1 = vmov 1983009808   ;;  %v254_v29 = vmov 0.0   ;;  %s323_s1 = inlined_call_operand.vmem [shape: s32[1,512], index: 1, kind: input, shape index: {}]   ;;  %s324_s0 = inlined_call_operand.vmem [shape: f32[4,512], index: 0, kind: input, shape index: {}]   ;;  %s325_s3 = inlined_call_operand.vmem [shape: bf16[4,512], index: 3, kind: output, shape index: {1}]   ;;  %s326_s2 = inlined_call_operand.vmem [shape: f32[4,512], index: 2, kind: output, shape index: {0}]  }
   0x1   :  { %v179_v2 = vunpack.c.l.s4 %v253_v1  ;;  %v13_v3 = vld [vmem:[%s324_s0] sm:$0xff]  ;;  %v281_v4 = vld [vmem:[%s324_s0 + $0x8] sm:$0xff] }
   0x2   :  { %v111_v5 = vshrl.u32 %v110_v0, 7  ;;  %v17_v6 = vcombine.high %v13_v3, %v13_v3  ;;  %v22_v7 = vsel %vm21_vm0, %v13_v3, -inf  ;;  %v135_v8 = vld [vmem:[%s323_s1] sm:$0xf]  ;;  %v18_v11 = vcombine.high %v281_v4, %v281_v4 }
   0x3   :  { %v180_v9 = vunpack.c.0.s8 %v179_v2  ;;  %v23_v10 = vrot.slane %v22_v7, 4  ;;  %v36_v12 = vsel %vm21_vm0, %v281_v4, -inf }
   0x4   :  { %v138_v13 = vsub.s32 0, %v111_v5  ;;  %v142_v14 = vsub.s32 1, %v111_v5  ;;  %v146_v15 = vsub.s32 2, %v111_v5  ;;  %v150_v16 = vsub.s32 3, %v111_v5 }
   0x5   :  { %v183_v17 = vsub.s32 %v180_v9, %v111_v5  ;;  %v24_v18 = vmax.f32 %v22_v7, %v23_v10  ;;  %v29_v19 = vsel %vm21_vm0, %v17_v6, -inf  ;;  %v37_v20 = vrot.slane %v36_v12, 4 }
   0x6   :  { %v139_v21 = vrot.slane %v135_v8, %v138_v13  ;;  %v143_v22 = vrot.slane %v135_v8, %v142_v14  ;;  %v147_v23 = vrot.slane %v135_v8, %v146_v15  ;;  %v151_v24 = vrot.slane %v135_v8, %v150_v16 }
   0x7   :  { %v25_v25 = vrot.slane %v24_v18, 2  ;;  %v30_v26 = vrot.slane %v29_v19, 4  ;;  %v38_v27 = vmax.f32 %v36_v12, %v37_v20  ;;  %v43_v28 = vsel %vm21_vm0, %v18_v11, -inf }
   0x8   :  { %vm152_vm1 = vcmp.eq.s32.totalorder %v139_v21, %v111_v5  ;;  %vm153_vm2 = vcmp.eq.s32.totalorder %v143_v22, %v111_v5  ;;  %vm154_vm3 = vcmp.eq.s32.totalorder %v147_v23, %v111_v5  ;;  %vm155_vm4 = vcmp.eq.s32.totalorder %v151_v24, %v111_v5 }
   0x9   :  { %v293_v30 = vsel %vm152_vm1, 1.0, %v254_v29  ;;  %v295_v31 = vsel %vm153_vm2, 1.0, %v254_v29  ;;  %v297_v32 = vsel %vm154_vm3, 1.0, %v254_v29  ;;  %v299_v33 = vsel %vm155_vm4, 1.0, %v254_v29 }
   0xa   :  { %v239_v34 = vpack.c.bf16 %v295_v31, %v293_v30  ;;  %v240_v35 = vpack.c.bf16 %v299_v33, %v297_v32  ;;  %v26_v36 = vmax.f32 %v24_v18, %v25_v25  ;;  %v31_v37 = vmax.f32 %v29_v19, %v30_v26 }
   0xb   :  { %v39_v38 = vrot.slane %v38_v27, 2  ;;  %v44_v39 = vrot.slane %v43_v28, 4 }
   0xc   :  { %v184_v40 = vrot.slane %v239_v34, %v183_v17  ;;  %v191_v41 = vrot.slane %v240_v35, %v183_v17  ;;  %v27_v42 = vrot.slane %v26_v36, 1  ;;  %v32_v43 = vrot.slane %v31_v37, 2 }
   0xd   :  { %v40_v44 = vmax.f32 %v38_v27, %v39_v38  ;;  %v45_v45 = vmax.f32 %v43_v28, %v44_v39 }
   0xe   :  { %v192_v46 = vcombine.low %v184_v40, %v191_v41  ;;  %v33_v47 = vmax.f32 %v31_v37, %v32_v43  ;;  %v28_v50 = vmax.f32 %v26_v36, %v27_v42 }
   0xf   :  { %v41_v48 = vrot.slane %v40_v44, 1  ;;  %v46_v49 = vrot.slane %v45_v45, 2 }
  0x10   :  { %194 = vst [vmem:[%s325_s3] sm:$0xff] %v192_v46  ;;  %v34_v51 = vrot.slane %v33_v47, 1 }
  0x11   :  { %v47_v52 = vmax.f32 %v45_v45, %v46_v49  ;;  %v42_v54 = vmax.f32 %v40_v44, %v41_v48 }
  0x12   :  { %v35_v53 = vmax.f32 %v33_v47, %v34_v51 }
  0x13   :  { %v48_v55 = vrot.slane %v47_v52, 1 }
  0x14   :  { %v54_v56 = vcombine.low %v28_v50, %v35_v53 }
  0x15   :  { %v49_v57 = vmax.f32 %v47_v52, %v48_v55 }
  0x16   :  { %v58_v58 = vsub.f32 %v13_v3, %v54_v56 }
  0x17   :  { %v55_v59 = vcombine.low %v42_v54, %v49_v57 }
  0x18   :  { %v60_v60 = vmul.f32 1.442695, %v58_v58 }
  0x19   :  { %v59_v61 = vsub.f32 %v281_v4, %v55_v59 }
  0x1a   :  { %245 = vpow2.f32 %v60_v60 }
  0x1b   :  { %v62_v62 = vmul.f32 1.442695, %v59_v61 }
  0x1d   :  { %247 = vpow2.f32 %v62_v62 }
  0x27   :  { %v246_v63 = vpop.eup %245 }
  0x28   :  { %v66_v0 = vcombine.high %v246_v63, %v246_v63  ;;  %v70_v1 = vsel %vm21_vm0, %v246_v63, 0.0 }
  0x29   :  { %v71_v2 = vrot.slane %v70_v1, 4 }
  0x2a   :  { %v248_v5 = vpop.eup %247  ;;  %v77_v6 = vsel %vm21_vm0, %v66_v0, 0.0 }
  0x2b   :  { %v72_v7 = vadd.f32 %v71_v2, %v70_v1  ;;  %v78_v8 = vrot.slane %v77_v6, 4  ;;  %v67_v9 = vcombine.high %v248_v5, %v248_v5  ;;  %v84_v3 = vsel %vm21_vm0, %v248_v5, 0.0 }
  0x2c   :  { %v85_v10 = vrot.slane %v84_v3, 4 }
  0x2d   :  { %v73_v11 = vrot.slane %v72_v7, 2  ;;  %v79_v12 = vadd.f32 %v78_v8, %v77_v6  ;;  %v91_v4 = vsel %vm21_vm0, %v67_v9, 0.0 }
  0x2e   :  { %v86_v13 = vadd.f32 %v85_v10, %v84_v3  ;;  %v92_v14 = vrot.slane %v91_v4, 4 }
  0x2f   :  { %v74_v15 = vadd.f32 %v73_v11, %v72_v7  ;;  %v80_v16 = vrot.slane %v79_v12, 2 }
  0x30   :  { %v87_v17 = vrot.slane %v86_v13, 2  ;;  %v93_v18 = vadd.f32 %v92_v14, %v91_v4 }
  0x31   :  { %v75_v19 = vrot.slane %v74_v15, 1  ;;  %v81_v20 = vadd.f32 %v80_v16, %v79_v12 }
  0x32   :  { %v88_v21 = vadd.f32 %v87_v17, %v86_v13  ;;  %v94_v22 = vrot.slane %v93_v18, 2 }
  0x33   :  { %v76_v23 = vadd.f32 %v75_v19, %v74_v15  ;;  %v82_v24 = vrot.slane %v81_v20, 1 }
  0x34   :  { %v89_v25 = vrot.slane %v88_v21, 1  ;;  %v95_v26 = vadd.f32 %v94_v22, %v93_v18 }
  0x35   :  { %v83_v27 = vadd.f32 %v82_v24, %v81_v20 }
  0x36   :  { %v90_v28 = vadd.f32 %v89_v25, %v88_v21  ;;  %v96_v29 = vrot.slane %v95_v26, 1 }
  0x37   :  { %v102_v34 = vcombine.low %v76_v23, %v83_v27 }
  0x38   :  { %v97_v35 = vadd.f32 %v96_v29, %v95_v26 }
  0x39   :  { %249 = vrcp.f32 %v102_v34 }
  0x3a   :  { %v103_v36 = vcombine.low %v90_v28, %v97_v35 }
  0x3c   :  { %251 = vrcp.f32 %v103_v36 }
  0x46   :  { %v250_v37 = vpop.eup %249 }
  0x47   :  { %v107_v38 = vmul.f32 %v250_v37, %v246_v63 }
  0x49   :  { %v252_v39 = vpop.eup %251  ;;  %v197_v40 = vcombine.high %v107_v38, %v107_v38  ;;  %v201_v41 = vsub.f32 %v293_v30, %v107_v38 }
  0x4a   :  { %v109_v42 = vmul.f32 %v252_v39, %v248_v5 }
  0x4b   :  { %v202_v43 = vsub.f32 %v295_v31, %v197_v40  ;;  %v205_v44 = vand.u32 2147483647, %v201_v41 }
  0x4c   :  { %v198_v45 = vcombine.high %v109_v42, %v109_v42  ;;  %v203_v46 = vsub.f32 %v297_v32, %v109_v42 }
  0x4d   :  { %v206_v47 = vand.u32 2147483647, %v202_v43  ;;  %v213_v48 = vsub.f32 0.0, %v205_v44 }
  0x4e   :  { %v204_v49 = vsub.f32 %v299_v33, %v198_v45  ;;  %v207_v50 = vand.u32 2147483647, %v203_v46 }
  0x4f   :  { %v214_v51 = vsub.f32 0.0, %v206_v47 }
  0x50   :  { %v208_v52 = vand.u32 2147483647, %v204_v49  ;;  %v215_v53 = vsub.f32 0.0, %v207_v50 }
  0x51   :  { %v221_v54 = vcombine.low %v213_v48, %v214_v51 }
  0x52   :  { %v216_v55 = vsub.f32 0.0, %v208_v52 }
  0x53   :  { %225 = vst [vmem:[%s326_s2] sm:$0xff] %v221_v54 }
  0x54   :  { %v222_v30 = vcombine.low %v215_v53, %v216_v55 }
  0x56   :  { %226 = vst [vmem:[%s326_s2 + $0x8] sm:$0xff] %v222_v30 }

// kernel: lovasz_loss.3
= control target key start
LH: loop header
LB: loop body
LE: loop exit
PB: predicated region body
PF: predicated region fallthrough
CT: control target
= control target key end

     0   :  { %s535_s14 = smov 1   ;;  %v27_v7 = vlaneseq  ;;  %s537_s15 = smov 4   ;;  %vm18_vm10 = vcmask 3072   ;;  %s657_s1 = inlined_call_operand.vmem [shape: bf16[4,512], index: 1, kind: input, shape index: {}]   ;;  %s658_s2 = inlined_call_operand.vmem [shape: f32[4,1], index: 2, kind: input, shape index: {}]   ;;  %s659_s3 = inlined_call_operand.vmem [shape: f32[4,1], index: 3, kind: output, shape index: {}]   ;;  %s660_s0 = inlined_call_operand.vmem [shape: f32[4,512], index: 0, kind: input, shape index: {}]  }
   0x1   :  { %v21_v0 = vld [vmem:[%s657_s1] sm:$0xff]  ;;  %s536_s1 = smov 2   ;;  %s538_s16 = smov 8  }
   0x2   :  { %v568_v1 = vunpack.c.l.bf16 %v21_v0  ;;  %v570_v2 = vunpack.c.h.bf16 %v21_v0  ;;  %v581_v8 = vand.u32 127, %v27_v7  ;;  %s539_s17 = smov 16   ;;  %s541_s18 = smov 32  }
   0x3   :  { %s543_s19 = smov 64  }
   0x4   :  { %v35_v3 = vcombine.high %v570_v2, %v570_v2  ;;  %v34_v4 = vcombine.high %v568_v1, %v568_v1  ;;  %vm46_vm0 = vcmp.lt.s32.totalorder %v581_v8, 1  ;;  %vm51_vm1 = vcmp.ge.s32.totalorder %v581_v8, 1 }
   0x5   :  { %vm83_vm2 = vcmp.lt.s32.totalorder %v581_v8, 2  ;;  %vm88_vm3 = vcmp.ge.s32.totalorder %v581_v8, 2  ;;  %vm120_vm4 = vcmp.lt.s32.totalorder %v581_v8, 4  ;;  %vm125_vm5 = vcmp.ge.s32.totalorder %v581_v8, 4 }
   0x6   :  { %v507_v5 = vpack.i.bf16 %v35_v3, %v568_v1  ;;  %v512_v6 = vpack.i.bf16 %v570_v2, %v34_v4  ;;  %vm157_vm6 = vcmp.lt.s32.totalorder %v581_v8, 8  ;;  %vm162_vm7 = vcmp.ge.s32.totalorder %v581_v8, 8 }
   0x7   :  { %vm194_vm8 = vcmp.lt.s32.totalorder %v581_v8, 16  ;;  %vm199_vm9 = vcmp.ge.s32.totalorder %v581_v8, 16  ;;  %vm231_vm11 = vcmp.lt.s32.totalorder %v581_v8, 32  ;;  %vm236_vm12 = vcmp.ge.s32.totalorder %v581_v8, 32 }
   0x8   :  { %508 = vrot.lane.b32.xlu0 %v507_v5, %s535_s14  ;;  %vm268_vm13 = vcmp.lt.s32.totalorder %v581_v8, 64  ;;  %vm273_vm14 = vcmp.ge.s32.totalorder %v581_v8, 64  ;;  %vm405_vm15 = vcmp.eq.s32.totalorder %v581_v8, 0 }
   0xc   :  { %513 = vrot.lane.b32.xlu0 %v512_v6, %s535_s14 }
  0x7a   :  { %v509_v9 = vpop.permute.xlu0 %508 }
  0x7b   :  { %v511_v10 = vunpack.i.h.bf16 %v509_v9  ;;  %v510_v11 = vunpack.i.l.bf16 %v509_v9 }
  0x7d   :  { %v50_v12 = vsel %vm46_vm0, %v511_v10, %v510_v11 }
  0x7e   :  { %v514_v13 = vpop.permute.xlu0 %513  ;;  %v55_v19 = vsel %vm51_vm1, %v50_v12, 0.0 }
  0x7f   :  { %v516_v14 = vunpack.i.h.bf16 %v514_v13  ;;  %v515_v15 = vunpack.i.l.bf16 %v514_v13 }
  0x81   :  { %v47_v16 = vsel %vm46_vm0, %v516_v14, %v511_v10  ;;  %v48_v17 = vsel %vm46_vm0, %v515_v15, %v516_v14  ;;  %v49_v18 = vsel %vm46_vm0, %v510_v11, %v515_v15  ;;  %vm472_vm0 = vcmask 1043456  }
  0x82   :  { %v63_v20 = vcombine.low %v55_v19, %v49_v18  ;;  %v64_v21 = vcombine.low %v48_v17, %v47_v16 }
  0x84   :  { %v67_v22 = vadd.f32 %v63_v20, %v568_v1  ;;  %v68_v23 = vadd.f32 %v64_v21, %v570_v2 }
  0x86   :  { %75 = vrot.lane.b32.xlu1 %v67_v22, %s536_s1  ;;  %79 = vrot.lane.b32.xlu0 %v68_v23, %s536_s1  ;;  %v71_v24 = vcombine.high %v67_v22, %v67_v22  ;;  %v72_v25 = vcombine.high %v68_v23, %v68_v23 }
  0x8a   :  { %77 = vrot.lane.b32.xlu1 %v71_v24, %s536_s1 }
  0x8e   :  { %81 = vrot.lane.b32.xlu1 %v72_v25, %s536_s1 }
  0xf8   :  { %v76_v26 = vpop.permute.xlu1 %75  ;;  %v80_v28 = vpop.permute.xlu0 %79 }
  0xfc   :  { %v78_v27 = vpop.permute.xlu1 %77 }
  0xfd   :  { %v85_v30 = vsel %vm83_vm2, %v78_v27, %v80_v28  ;;  %v86_v33 = vsel %vm83_vm2, %v76_v26, %v78_v27  ;;  %v542_v27 = vmov 0  }
  0xfe   :  { %517 = vset.pattern.permute.xlu0 %v542_v27  ;;  %518 = vset.pattern.permute.xlu1 %v542_v27 }
 0x100   :  { %v82_v29 = vpop.permute.xlu1 %81 }
 0x101   :  { %v84_v31 = vsel %vm83_vm2, %v80_v28, %v82_v29  ;;  %v87_v32 = vsel %vm83_vm2, %v82_v29, %v76_v26 }
 0x102   :  { %v92_v34 = vsel %vm88_vm3, %v87_v32, 0.0  ;;  %v101_v35 = vcombine.low %v85_v30, %v84_v31 }
 0x103   :  { %v100_v36 = vcombine.low %v92_v34, %v86_v33 }
 0x104   :  { %v105_v37 = vadd.f32 %v101_v35, %v68_v23  ;;  %v540_v23 = vmov 0.0  }
 0x105   :  { %v104_v38 = vadd.f32 %v100_v36, %v67_v22  ;;  %20 = vst.msk [vmem:[#allocation2] sm:$0xf] %vm18_vm10, %v540_v23  ;;  %19 = vst.msk [vmem:[%s659_s3] sm:$0xf] %vm18_vm10, %v540_v23 }
 0x106   :  { %v109_v39 = vcombine.high %v105_v37, %v105_v37 }
 0x107   :  { %112 = vrot.lane.b32.xlu0 %v104_v38, %s537_s15  ;;  %v108_v40 = vcombine.high %v104_v38, %v104_v38 }
 0x108   :  { %118 = vrot.lane.b32.xlu1 %v109_v39, %s537_s15 }
 0x10b   :  { %114 = vrot.lane.b32.xlu0 %v108_v40, %s537_s15 }
 0x10c   :  { %116 = vrot.lane.b32.xlu1 %v105_v37, %s537_s15 }
 0x179   :  { %v113_v41 = vpop.permute.xlu0 %112 }
 0x17a   :  { %v119_v42 = vpop.permute.xlu1 %118 }
 0x17b   :  { %v124_v43 = vsel %vm120_vm4, %v119_v42, %v113_v41 }
 0x17c   :  { %v129_v45 = vsel %vm125_vm5, %v124_v43, 0.0  ;;  %v339_v43 = vld [vmem:[#allocation2] sm:$0xf] }
 0x17d   :  { %v115_v44 = vpop.permute.xlu0 %114 }
 0x17e   :  { %v123_v46 = vsel %vm120_vm4, %v113_v41, %v115_v44  ;;  %v117_v47 = vpop.permute.xlu1 %116 }
 0x17f   :  { %v137_v48 = vcombine.low %v129_v45, %v123_v46  ;;  %v121_v49 = vsel %vm120_vm4, %v117_v47, %v119_v42  ;;  %v122_v50 = vsel %vm120_vm4, %v115_v44, %v117_v47  ;;  %v26_v44 = vld [vmem:[%s658_s2] sm:$0xf] }
 0x180   :  { %v138_v51 = vcombine.low %v122_v50, %v121_v49 }
 0x181   :  { %v141_v52 = vadd.f32 %v137_v48, %v104_v38 }
 0x182   :  { %v142_v54 = vadd.f32 %v138_v51, %v105_v37 }
 0x183   :  { %149 = vrot.lane.b32.xlu0 %v141_v52, %s538_s16  ;;  %v145_v53 = vcombine.high %v141_v52, %v141_v52 }
 0x184   :  { %v146_v55 = vcombine.high %v142_v54, %v142_v54 }
 0x185   :  { %151 = vrot.lane.b32.xlu1 %v145_v53, %s538_s16 }
 0x187   :  { %153 = vrot.lane.b32.xlu0 %v142_v54, %s538_s16 }
 0x189   :  { %155 = vrot.lane.b32.xlu1 %v146_v55, %s538_s16  ;;  %v544_v55 = vmov 839922192  }
 0x1f5   :  { %v150_v56 = vpop.permute.xlu0 %149 }
 0x1f7   :  { %v152_v57 = vpop.permute.xlu1 %151 }
 0x1f8   :  { %v160_v63 = vsel %vm157_vm6, %v150_v56, %v152_v57 }
 0x1f9   :  { %v154_v58 = vpop.permute.xlu0 %153 }
 0x1fa   :  { %v159_v60 = vsel %vm157_vm6, %v152_v57, %v154_v58 }
 0x1fb   :  { %v156_v59 = vpop.permute.xlu1 %155 }
 0x1fc   :  { %v158_v61 = vsel %vm157_vm6, %v154_v58, %v156_v59  ;;  %v161_v62 = vsel %vm157_vm6, %v156_v59, %v150_v56  ;;  %v345_v56 = vunpack.c.l.s4 %v544_v55  ;;  %v31_v58 = vadd.s32 384, %v581_v8 }
 0x1fd   :  { %v166_v0 = vsel %vm162_vm7, %v161_v62, 0.0  ;;  %v175_v3 = vcombine.low %v159_v60, %v158_v61  ;;  %v29_v59 = vadd.s32 128, %v581_v8  ;;  %v30_v61 = vadd.s32 256, %v581_v8 }
 0x1fe   :  { %v174_v4 = vcombine.low %v166_v0, %v160_v63  ;;  %v360_v63 = vadd.s32 1, %v581_v8 }
 0x1ff   :  { %v179_v5 = vadd.f32 %v175_v3, %v142_v54 }
 0x200   :  { %v178_v6 = vadd.f32 %v174_v4, %v141_v52  ;;  %v346_v4 = vunpack.c.0.s8 %v345_v56 }
 0x201   :  { %v183_v9 = vcombine.high %v179_v5, %v179_v5 }
 0x202   :  { %186 = vrot.lane.b32.xlu0 %v178_v6, %s539_s17  ;;  %v182_v10 = vcombine.high %v178_v6, %v178_v6 }
 0x203   :  { %192 = vrot.lane.b32.xlu1 %v183_v9, %s539_s17  ;;  %v361_v9 = vadd.s32 1, %v29_v59 }
 0x206   :  { %188 = vrot.lane.b32.xlu0 %v182_v10, %s539_s17 }
 0x207   :  { %190 = vrot.lane.b32.xlu1 %v179_v5, %s539_s17 }
 0x274   :  { %v187_v11 = vpop.permute.xlu0 %186 }
 0x275   :  { %v193_v12 = vpop.permute.xlu1 %192 }
 0x276   :  { %v198_v13 = vsel %vm194_vm8, %v193_v12, %v187_v11 }
 0x277   :  { %v203_v15 = vsel %vm199_vm9, %v198_v13, 0.0  ;;  %v364_v13 = vcvt.s32.f32 %v360_v63 }
 0x278   :  { %v189_v14 = vpop.permute.xlu0 %188 }
 0x279   :  { %v197_v16 = vsel %vm194_vm8, %v187_v11, %v189_v14  ;;  %v191_v17 = vpop.permute.xlu1 %190 }
 0x27a   :  { %v211_v18 = vcombine.low %v203_v15, %v197_v16  ;;  %v195_v19 = vsel %vm194_vm8, %v191_v17, %v193_v12  ;;  %v196_v20 = vsel %vm194_vm8, %v189_v14, %v191_v17  ;;  %v362_v12 = vadd.s32 1, %v30_v61 }
 0x27b   :  { %v212_v21 = vcombine.low %v196_v20, %v195_v19  ;;  %v333_v14 = vcombine.low %v540_v23, %v540_v23 }
 0x27c   :  { %v215_v22 = vadd.f32 %v211_v18, %v178_v6  ;;  %v363_v6 = vadd.s32 1, %v31_v58  ;;  %v365_v18 = vcvt.s32.f32 %v361_v9  ;;  %v366_v20 = vcvt.s32.f32 %v362_v12 }
 0x27d   :  { %v216_v25 = vadd.f32 %v212_v21, %v179_v5  ;;  %v348_v5 = vshrl.u32 %v27_v7, 7 }
 0x27e   :  { %223 = vrot.lane.b32.xlu0 %v215_v22, %s541_s18  ;;  %v219_v24 = vcombine.high %v215_v22, %v215_v22  ;;  %v367_v17 = vcvt.s32.f32 %v363_v6 }
 0x27f   :  { %v220_v26 = vcombine.high %v216_v25, %v216_v25  ;;  %v349_v15 = vsub.s32 %v346_v4, %v348_v5 }
 0x280   :  { %225 = vrot.lane.b32.xlu1 %v219_v24, %s541_s18 }
 0x282   :  { %227 = vrot.lane.b32.xlu0 %v216_v25, %s541_s18 }
 0x284   :  { %229 = vrot.lane.b32.xlu1 %v220_v26, %s541_s18 }
 0x2f0   :  { %v224_v28 = vpop.permute.xlu0 %223 }
 0x2f2   :  { %v226_v29 = vpop.permute.xlu1 %225 }
 0x2f3   :  { %v234_v35 = vsel %vm231_vm11, %v224_v28, %v226_v29 }
 0x2f4   :  { %v228_v30 = vpop.permute.xlu0 %227 }
 0x2f5   :  { %v233_v32 = vsel %vm231_vm11, %v226_v29, %v228_v30 }
 0x2f6   :  { %v230_v31 = vpop.permute.xlu1 %229 }
 0x2f7   :  { %v232_v33 = vsel %vm231_vm11, %v228_v30, %v230_v31  ;;  %v235_v34 = vsel %vm231_vm11, %v230_v31, %v224_v28  ;;  %v496_v28 = vadd.f32 -1.0, %v367_v17  ;;  %v494_v30 = vadd.f32 -1.0, %v365_v18 }
 0x2f8   :  { %v240_v36 = vsel %vm236_vm12, %v235_v34, 0.0  ;;  %v249_v37 = vcombine.low %v233_v32, %v232_v33  ;;  %v495_v33 = vadd.f32 -1.0, %v366_v20 }
 0x2f9   :  { %v248_v38 = vcombine.low %v240_v36, %v234_v35 }
 0x2fa   :  { %v253_v39 = vadd.f32 %v249_v37, %v216_v25 }
 0x2fb   :  { %v252_v40 = vadd.f32 %v248_v38, %v215_v22  ;;  %v493_v22 = vadd.f32 -1.0, %v364_v13 }
 0x2fc   :  { %v257_v41 = vcombine.high %v253_v39, %v253_v39 }
 0x2fd   :  { %260 = vrot.lane.b32.xlu0 %v252_v40, %s543_s19  ;;  %v256_v42 = vcombine.high %v252_v40, %v252_v40 }
 0x2fe   :  { %266 = vrot.lane.b32.xlu1 %v257_v41, %s543_s19 }
 0x301   :  { %262 = vrot.lane.b32.xlu0 %v256_v42, %s543_s19 }
 0x302   :  { %264 = vrot.lane.b32.xlu1 %v253_v39, %s543_s19 }
 0x305   :  { %342 = vperm.xlu0 %517, %v339_v43  }
 0x306   :  { %370 = vperm.xlu1 %518, %v26_v44  }
 0x36f   :  { %v261_v45 = vpop.permute.xlu0 %260 }
 0x370   :  { %v267_v46 = vpop.permute.xlu1 %266 }
 0x371   :  { %v272_v47 = vsel %vm268_vm13, %v267_v46, %v261_v45 }
 0x372   :  { %v277_v49 = vsel %vm273_vm14, %v272_v47, 0.0 }
 0x373   :  { %v263_v48 = vpop.permute.xlu0 %262 }
 0x374   :  { %v271_v50 = vsel %vm268_vm13, %v261_v45, %v263_v48  ;;  %v265_v51 = vpop.permute.xlu1 %264 }
 0x375   :  { %v285_v52 = vcombine.low %v277_v49, %v271_v50  ;;  %v269_v53 = vsel %vm268_vm13, %v265_v51, %v267_v46  ;;  %v270_v54 = vsel %vm268_vm13, %v263_v48, %v265_v51 }
 0x376   :  { %v286_v57 = vcombine.low %v270_v54, %v269_v53 }
 0x377   :  { %v289_v60 = vadd.f32 %v285_v52, %v252_v40 }
 0x378   :  { %v290_v62 = vadd.f32 %v286_v57, %v253_v39 }
 0x379   :  { %v309_v0 = vcombine.low %v540_v23, %v289_v60  ;;  %v293_v3 = vcombine.high %v289_v60, %v289_v60 }
 0x37b   :  { %v310_v10 = vcombine.low %v293_v3, %v290_v62  ;;  %v313_v11 = vadd.f32 %v309_v0, %v289_v60 }
 0x37d   :  { %v317_v16 = vcombine.high %v313_v11, %v313_v11  ;;  %v314_v7 = vadd.f32 %v310_v10, %v290_v62  ;;  %v337_v24 = vadd.f32 %v333_v14, %v313_v11 }
 0x37f   :  { %v334_v19 = vcombine.low %v313_v11, %v317_v16 }
 0x380   :  { %v343_v21 = vpop.permute.xlu0 %342 }
 0x381   :  { %v338_v25 = vadd.f32 %v334_v19, %v314_v7  ;;  %v350_v26 = vrot.slane %v343_v21, %v349_v15  ;;  %v617_v27 = vpop.permute.xlu1 %370 }
 0x382   :  { %v383_v29 = vadd.f32 %v617_v27, %v364_v13  ;;  %v386_v32 = vadd.f32 %v617_v27, %v367_v17  ;;  %v384_v34 = vadd.f32 %v617_v27, %v365_v18  ;;  %v385_v35 = vadd.f32 %v617_v27, %v366_v20 }
 0x383   :  { %v352_v31 = vadd.f32 %v350_v26, %v337_v24  ;;  %v353_v23 = vadd.f32 %v350_v26, %v338_v25  ;;  %v413_v36 = vadd.f32 %v493_v22, %v617_v27  ;;  %v416_v41 = vadd.f32 %v496_v28, %v617_v27 }
 0x384   :  { %v414_v43 = vadd.f32 %v494_v30, %v617_v27  ;;  %v415_v47 = vadd.f32 %v495_v33, %v617_v27 }
 0x385   :  { %v375_v37 = vcombine.high %v352_v31, %v352_v31  ;;  %v403_v38 = vsub.f32 %v352_v31, %v568_v1  ;;  %v404_v39 = vsub.f32 %v353_v23, %v570_v2  ;;  %v376_v40 = vcombine.high %v353_v23, %v353_v23 }
 0x386   :  { %v387_v42 = vsub.f32 %v383_v29, %v352_v31  ;;  %v389_v49 = vsub.f32 %v385_v35, %v353_v23  ;;  %v379_v59 = vsub.f32 %v617_v27, %v352_v31  ;;  %v381_v63 = vsub.f32 %v617_v27, %v353_v23  ;;  %v25_v31 = vld [vmem:[%s660_s0 + $0x8] sm:$0xff] }
 0x387   :  { %v419_v44 = vcombine.high %v403_v38, %v403_v38  ;;  %v420_v45 = vcombine.high %v404_v39, %v404_v39  ;;  %485 = vrot.lane.b32.xlu0 %v376_v40, %s535_s14  ;;  %v390_v46 = vsub.f32 %v386_v32, %v376_v40  ;;  %v388_v48 = vsub.f32 %v384_v34, %v375_v37 }
 0x388   :  { %519 = vrcp.f32 %v387_v42  ;;  %v423_v1 = vsub.f32 %v413_v36, %v403_v38  ;;  %v425_v52 = vsub.f32 %v415_v47, %v404_v39  ;;  %v382_v56 = vsub.f32 %v617_v27, %v376_v40 }
 0x389   :  { %521 = vrcp.f32 %v390_v46  ;;  %v426_v2 = vsub.f32 %v416_v41, %v420_v45  ;;  %v424_v50 = vsub.f32 %v414_v43, %v419_v44  ;;  %v434_v57 = vsub.f32 %v617_v27, %v420_v45 }
 0x38a   :  { %523 = vrcp.f32 %v388_v48  ;;  %v427_v51 = vsel %vm405_vm15, 1.0, %v423_v1  ;;  %v380_v60 = vsub.f32 %v617_v27, %v375_v37  ;;  %v431_v0 = vsub.f32 %v617_v27, %v403_v38 }
 0x38b   :  { %525 = vrcp.f32 %v426_v2  ;;  %v432_v9 = vsub.f32 %v617_v27, %v419_v44  ;;  %v433_v12 = vsub.f32 %v617_v27, %v404_v39  ;;  %v24_v27 = vld [vmem:[%s660_s0] sm:$0xff] }
 0x38c   :  { %527 = vrcp.f32 %v389_v49  ;;  %v451_v44 = vld [vmem:[%s659_s3] sm:$0xf] }
 0x38d   :  { %529 = vrcp.f32 %v427_v51 }
 0x38e   :  { %531 = vrcp.f32 %v424_v50 }
 0x38f   :  { %533 = vrcp.f32 %v425_v52 }
 0x395   :  { %v520_v53 = vpop.eup %519 }
 0x396   :  { %v522_v54 = vpop.eup %521  ;;  %v392_v5 = vmul.f32 %v520_v53, %v379_v59 }
 0x397   :  { %v524_v55 = vpop.eup %523  ;;  %v398_v62 = vmul.f32 %v522_v54, %v382_v56 }
 0x398   :  { %v526_v58 = vpop.eup %525  ;;  %v394_v6 = vmul.f32 %v524_v55, %v380_v60  ;;  %v399_v19 = vsub.f32 1.0, %v392_v5 }
 0x399   :  { %v528_v61 = vpop.eup %527  ;;  %v442_v3 = vmul.f32 %v526_v58, %v434_v57  ;;  %v402_v17 = vsub.f32 1.0, %v398_v62 }
 0x39a   :  { %v530_v4 = vpop.eup %529  ;;  %v396_v11 = vmul.f32 %v528_v61, %v381_v63  ;;  %v400_v20 = vsub.f32 1.0, %v394_v6 }
 0x39b   :  { %v532_v10 = vpop.eup %531  ;;  %v436_v13 = vmul.f32 %v530_v4, %v431_v0  ;;  %v446_v14 = vsub.f32 1.0, %v442_v3 }
 0x39c   :  { %v534_v15 = vpop.eup %533  ;;  %v438_v16 = vmul.f32 %v532_v10, %v432_v9  ;;  %v401_v22 = vsub.f32 1.0, %v396_v11 }
 0x39d   :  { %v440_v18 = vmul.f32 %v534_v15, %v433_v12  ;;  %v443_v7 = vsub.f32 1.0, %v436_v13  ;;  %v455_v26 = vsub.f32 %v446_v14, %v402_v17 }
 0x39e   :  { %v444_v21 = vsub.f32 1.0, %v438_v16 }
 0x39f   :  { %v445_v24 = vsub.f32 1.0, %v440_v18  ;;  %v447_v25 = vsel %vm405_vm15, 0.0, %v443_v7 }
 0x3a0   :  { %v452_v28 = vsub.f32 %v447_v25, %v399_v19  ;;  %v453_v29 = vsub.f32 %v444_v21, %v400_v20 }
 0x3a1   :  { %v454_v30 = vsub.f32 %v445_v24, %v401_v22 }
 0x3a2   :  { %v460_v23 = vcombine.low %v452_v28, %v453_v29 }
 0x3a3   :  { %v461_v32 = vcombine.low %v454_v30, %v455_v26 }
 0x3a4   :  { %v464_v33 = vmul.f32 %v460_v23, %v24_v27 }
 0x3a5   :  { %v465_v34 = vmul.f32 %v461_v32, %v25_v31 }
 0x3a6   :  { %v468_v35 = vcombine.high %v464_v33, %v464_v33  ;;  %v473_v36 = vsel %vm472_vm0, %v464_v33, 0.0 }
 0x3a7   :  { %v469_v8 = vcombine.high %v465_v34, %v465_v34  ;;  %v476_v39 = vsel %vm472_vm0, %v465_v34, 0.0 }
 0x3a8   :  { %v474_v37 = vsel %vm472_vm0, %v468_v35, 0.0 }
 0x3a9   :  { %v475_v38 = vadd.f32 %v474_v37, %v473_v36  ;;  %v478_v41 = vsel %vm472_vm0, %v469_v8, 0.0 }
 0x3ab   :  { %v477_v40 = vadd.f32 %v476_v39, %v475_v38 }
 0x3ad   :  { %v479_v42 = vadd.f32 %v478_v41, %v477_v40 }
 0x3af   :  { %480 = vadd.xlane.f32.xlu1 %v479_v42 }
 0x3f9   :  { %v486_v43 = vpop.permute.xlu0 %485 }
 0x3fa   :  { %488 = vst.msk [vmem:[#allocation2] sm:$0xf] %vm18_vm10, %v486_v43 }
 0x438   :  { %v481_v45 = vpop.xlane.xlu1 %480 }
 0x439   :  { %v482_v46 = vadd.f32 %v481_v45, %v451_v44 }
 0x43b   :  { %484 = vst.msk [vmem:[%s659_s3] sm:$0xf] %vm18_vm10, %v482_v46 }

</bundles_post_ra>
